<compile_context>
chip_gen: v7x
topology: tpu7x:2x2x1
jax: 0.10.0
libtpu: 0.0.40
codegen_flags: <defaults>
</compile_context>

<pallas_src>
import jax
import jax.numpy as jnp
from jax.experimental import pallas as pl
from jax.experimental.pallas import tpu as pltpu


def _round_up(x, m):
    return (x + m - 1) // m * m


def _cdiv(a, b):
    return -(-a // b)


def _tpu_vmem_and_cores():
    """Best-effort VMEM capacity + TensorCore count; safe fallbacks."""
    vmem = 64 * 1024 * 1024   # conservative default (fits every generation)
    cores = 1
    try:
        info = pltpu.get_tpu_info()
        v = getattr(info, "vmem_capacity_bytes", None)
        if v:
            vmem = int(v)
        for attr in ("num_cores", "core_count", "tensorcore_count", "num_tensorcores"):
            c = getattr(info, attr, None)
            if c:
                cores = max(1, int(c))
                break
    except Exception:
        pass
    if cores == 1:
        try:
            kind = jax.devices()[0].device_kind.lower()
            # generations with 2 TensorCores per JAX device (megacore / v7x)
            if ("v4" in kind) or ("v5p" in kind) or ("v7" in kind):
                cores = 2
        except Exception:
            pass
    return vmem, cores


def jaccard_loss(pred, target, smooth=1.0):
    """JAX wrapper: tiled Pallas streaming reduction + tiny (N, C) epilogue."""
    N, C = int(pred.shape[0]), int(pred.shape[1])
    S = 1
    for d in pred.shape[2:]:
        S *= int(d)
    NC = N * C

    # Native dtype all the way to the kernel (reshape of contiguous arrays is
    # free); the f32 upcast happens on VMEM tiles inside the kernel.
    p = pred.reshape(NC, S)
    t = target.reshape(NC, S)

    # --- tile sizing --------------------------------------------------------
    vmem_bytes, num_cores = _tpu_vmem_and_cores()
    # Per-input tile budget in f32-equivalent elements. vmem/10 leaves room for
    # 2 inputs x 2 pipeline buffers plus in-kernel cast / ragged-edge mask
    # temporaries under the 3/4-of-VMEM scoped limit on every generation.
    tile_elems = max(8 * 128, (vmem_bytes // 10) // 4)

    # Prefer covering S in one lane-dense tile (kills the reduction axis), then
    # fill the remaining budget with rows.
    TILE_S = min(_round_up(S, 128), max(128, (tile_elems // 8) // 128 * 128))
    TILE_R = min(_round_up(NC, 8), max(8, (tile_elems // TILE_S) // 8 * 8))

    RB = _cdiv(NC, TILE_R)            # row blocks
    SB = _cdiv(S, TILE_S)             # spatial blocks

    # --- v7x / megacore: split the spatial reduction across TensorCores when
    # there is no row-level parallelism. Only even splits are used so no extra
    # (wasted) clamped blocks are ever generated on single-TC chips.
    num_splits = 1
    if num_cores > 1 and RB == 1 and SB >= 2:
        if SB % 2 == 1:
            cand = _round_up(_cdiv(S, SB + 1), 128)
            if 128 <= cand <= TILE_S and _cdiv(S, cand) % 2 == 0:
                TILE_S = cand
                SB = _cdiv(S, TILE_S)
        if SB % 2 == 0:
            num_splits = 2
    SBps = SB // num_splits           # spatial blocks handled by each split

    need_mask = (S % TILE_S) != 0     # only the ragged last spatial tile needs it
    NC_pad = RB * TILE_R

    # --- kernel -------------------------------------------------------------
    def kernel(p_ref, t_ref, inter_ref, psq_ref, tsq_ref):
        # Output blocks are resident across the (arbitrary) spatial axis:
        # zero on the first spatial step, accumulate afterwards.
        @pl.when(pl.program_id(2) == 0)
        def _():
            inter_ref[...] = jnp.zeros_like(inter_ref)
            psq_ref[...] = jnp.zeros_like(psq_ref)
            tsq_ref[...] = jnp.zeros_like(tsq_ref)

        pv = p_ref[...].astype(jnp.float32)     # [TILE_R, TILE_S]
        tv = t_ref[...].astype(jnp.float32)

        if need_mask:
            # Mask the loads past S on the ragged last spatial tile (the
            # contents of the out-of-bounds part of the block are unspecified).
            gblk = pl.program_id(0) * SBps + pl.program_id(2)
            limit = S - gblk * TILE_S
            cols = jax.lax.broadcasted_iota(jnp.int32, (1, TILE_S), 1)
            m = (cols < limit).astype(jnp.float32)      # (1, TILE_S) -> bcast rows
            pv = pv * m
            tv = tv * m

        inter_ref[...] += jnp.sum(pv * tv, axis=1, keepdims=True)
        psq_ref[...] += jnp.sum(pv * pv, axis=1, keepdims=True)
        tsq_ref[...] += jnp.sum(tv * tv, axis=1, keepdims=True)

    in_spec = pl.BlockSpec((TILE_R, TILE_S), lambda c, r, s: (r, c * SBps + s))
    out_spec = pl.BlockSpec((TILE_R, 1), lambda c, r, s: (c * RB + r, 0))
    out_sds = jax.ShapeDtypeStruct((num_splits * NC_pad, 1), jnp.float32)

    inter, psq, tsq = pl.pallas_call(
        kernel,
        out_shape=(out_sds, out_sds, out_sds),
        grid_spec=pltpu.PrefetchScalarGridSpec(
            num_scalar_prefetch=0,
            grid=(num_splits, RB, SBps),
            in_specs=[in_spec, in_spec],
            out_specs=[out_spec, out_spec, out_spec],
        ),
        compiler_params=pltpu.CompilerParams(
            dimension_semantics=("parallel", "parallel", "arbitrary"),
            vmem_limit_bytes=int(vmem_bytes * 3 // 4),
        ),
    )(p, t)

    # --- tiny O(N*C) epilogue, mirroring the PyTorch per-channel loop --------
    def finalize(x):
        x = x.reshape(num_splits, NC_pad)[:, :NC]       # drop padded rows
        return jnp.sum(x, axis=0).reshape(N, C)         # add core-split partials

    inter = finalize(inter)
    psq = finalize(psq)
    tsq = finalize(tsq)

    jac = inter / (psq + tsq - inter + smooth)           # per (n, c)
    jaccard = jnp.sum(jac, axis=1) / C                   # per sample
    return jnp.clip(jnp.mean(1.0 - jaccard), 0.0, 1.0)


def _reference_jaccard_loss(pred, target, smooth=1.0):
    """Pure-JAX reference mirroring the PyTorch module exactly."""
    N, C = pred.shape[0], pred.shape[1]
    p = pred.reshape(N, C, -1).astype(jnp.float32)
    t = target.reshape(N, C, -1).astype(jnp.float32)
    inter = jnp.sum(p * t, axis=-1)
    psq = jnp.sum(p * p, axis=-1)
    tsq = jnp.sum(t * t, axis=-1)
    jac = inter / (psq + tsq - inter + smooth)
    jaccard = jnp.sum(jac, axis=1) / C
    return jnp.clip(jnp.mean(1.0 - jaccard), 0.0, 1.0)


if __name__ == "__main__":
    key = jax.random.PRNGKey(0)
    k1, k2 = jax.random.split(key)

    # 5-D NCDHW inputs (the reference forward sums over 3 trailing dims of
    # pred[:, i]). Small shape: N=2, C=4, D=8, H=W=16.
    shape = (2, 4, 8, 16, 16)
    pred = jax.nn.sigmoid(jax.random.normal(k1, shape, dtype=jnp.float32))
    target = jax.random.bernoulli(k2, p=0.5, shape=shape).astype(jnp.float32)

    loss = jax.jit(jaccard_loss)(pred, target)
    loss = jax.block_until_ready(loss)

    ref = _reference_jaccard_loss(pred, target)
    assert jnp.allclose(loss, ref, rtol=1e-5, atol=1e-6), (loss, ref)

    print("KERNEL_OK")
</pallas_src>

<mosaic_0001>
module attributes {stable_mosaic.version = 11 : i64} {
  func.func @kernel(%arg0: i32, %arg1: i32, %arg2: i32, %arg3: memref<8x2048xf32, #tpu.memory_space<vmem>>, %arg4: memref<8x2048xf32, #tpu.memory_space<vmem>>, %arg5: memref<8x1xf32, #tpu.memory_space<vmem>>, %arg6: memref<8x1xf32, #tpu.memory_space<vmem>>, %arg7: memref<8x1xf32, #tpu.memory_space<vmem>>) attributes {dimension_semantics = [#tpu.dimension_semantics<parallel>, #tpu.dimension_semantics<parallel>, #tpu.dimension_semantics<arbitrary>], iteration_bounds = array<i64: 1, 1, 1>, scalar_prefetch = 0 : i64, scratch_operands = 0 : i64, tpu.core_type = #tpu.core_type<tc>, window_params = [{transform_indices = @transform_0, window_bounds = array<i64: 8, 2048>}, {transform_indices = @transform_1, window_bounds = array<i64: 8, 2048>}, {transform_indices = @transform_2, window_bounds = array<i64: 8, 1>}, {transform_indices = @transform_3, window_bounds = array<i64: 8, 1>}, {transform_indices = @transform_4, window_bounds = array<i64: 8, 1>}]} {
    %c0_i32 = arith.constant 0 : i32
    %0 = arith.cmpi eq, %arg2, %c0_i32 : i32
    %1 = arith.extui %0 : i1 to i32
    %c0_i32_0 = arith.constant 0 : i32
    %2 = arith.cmpi ne, %1, %c0_i32_0 : i32
    scf.if %2 {
      %cst_18 = arith.constant 0.000000e+00 : f32
      %23 = vector.broadcast %cst_18 : f32 to vector<8x1xf32>
      %c0_19 = arith.constant 0 : index
      %c0_20 = arith.constant 0 : index
      %24 = vector.load %arg5[%c0_19, %c0_20] : memref<8x1xf32, #tpu.memory_space<vmem>>, vector<8x1xf32>
      tpu.vector_store %arg5[%c0_19, %c0_20], %23 {strides = array<i32>} : memref<8x1xf32, #tpu.memory_space<vmem>>, vector<8x1xf32>,
      %cst_21 = arith.constant 0.000000e+00 : f32
      %25 = vector.broadcast %cst_21 : f32 to vector<8x1xf32>
      %c0_22 = arith.constant 0 : index
      %c0_23 = arith.constant 0 : index
      %26 = vector.load %arg6[%c0_22, %c0_23] : memref<8x1xf32, #tpu.memory_space<vmem>>, vector<8x1xf32>
      tpu.vector_store %arg6[%c0_22, %c0_23], %25 {strides = array<i32>} : memref<8x1xf32, #tpu.memory_space<vmem>>, vector<8x1xf32>,
      %cst_24 = arith.constant 0.000000e+00 : f32
      %27 = vector.broadcast %cst_24 : f32 to vector<8x1xf32>
      %c0_25 = arith.constant 0 : index
      %c0_26 = arith.constant 0 : index
      %28 = vector.load %arg7[%c0_25, %c0_26] : memref<8x1xf32, #tpu.memory_space<vmem>>, vector<8x1xf32>
      tpu.vector_store %arg7[%c0_25, %c0_26], %27 {strides = array<i32>} : memref<8x1xf32, #tpu.memory_space<vmem>>, vector<8x1xf32>,
    } else {
    }
    %c0 = arith.constant 0 : index
    %c0_1 = arith.constant 0 : index
    %3 = vector.load %arg3[%c0, %c0_1] : memref<8x2048xf32, #tpu.memory_space<vmem>>, vector<8x2048xf32>
    %c0_2 = arith.constant 0 : index
    %c0_3 = arith.constant 0 : index
    %4 = vector.load %arg4[%c0_2, %c0_3] : memref<8x2048xf32, #tpu.memory_space<vmem>>, vector<8x2048xf32>
    %c0_4 = arith.constant 0 : index
    %c0_5 = arith.constant 0 : index
    %5 = vector.load %arg5[%c0_4, %c0_5] : memref<8x1xf32, #tpu.memory_space<vmem>>, vector<8x1xf32>
    %6 = arith.mulf %3, %4 : vector<8x2048xf32>
    %cst = arith.constant dense<0.000000e+00> : vector<8xf32>
    %7 = vector.multi_reduction <add>, %6, %cst [1] : vector<8x2048xf32> to vector<8xf32>
    %8 = vector.shape_cast %7 : vector<8xf32> to vector<8x1xf32>
    %9 = arith.addf %5, %8 : vector<8x1xf32>
    %c0_6 = arith.constant 0 : index
    %c0_7 = arith.constant 0 : index
    %10 = vector.load %arg5[%c0_6, %c0_7] : memref<8x1xf32, #tpu.memory_space<vmem>>, vector<8x1xf32>
    tpu.vector_store %arg5[%c0_6, %c0_7], %9 {strides = array<i32>} : memref<8x1xf32, #tpu.memory_space<vmem>>, vector<8x1xf32>,
    %c0_8 = arith.constant 0 : index
    %c0_9 = arith.constant 0 : index
    %11 = vector.load %arg6[%c0_8, %c0_9] : memref<8x1xf32, #tpu.memory_space<vmem>>, vector<8x1xf32>
    %12 = arith.mulf %3, %3 : vector<8x2048xf32>
    %cst_10 = arith.constant dense<0.000000e+00> : vector<8xf32>
    %13 = vector.multi_reduction <add>, %12, %cst_10 [1] : vector<8x2048xf32> to vector<8xf32>
    %14 = vector.shape_cast %13 : vector<8xf32> to vector<8x1xf32>
    %15 = arith.addf %11, %14 : vector<8x1xf32>
    %c0_11 = arith.constant 0 : index
    %c0_12 = arith.constant 0 : index
    %16 = vector.load %arg6[%c0_11, %c0_12] : memref<8x1xf32, #tpu.memory_space<vmem>>, vector<8x1xf32>
    tpu.vector_store %arg6[%c0_11, %c0_12], %15 {strides = array<i32>} : memref<8x1xf32, #tpu.memory_space<vmem>>, vector<8x1xf32>,
    %c0_13 = arith.constant 0 : index
    %c0_14 = arith.constant 0 : index
    %17 = vector.load %arg7[%c0_13, %c0_14] : memref<8x1xf32, #tpu.memory_space<vmem>>, vector<8x1xf32>
    %18 = arith.mulf %4, %4 : vector<8x2048xf32>
    %cst_15 = arith.constant dense<0.000000e+00> : vector<8xf32>
    %19 = vector.multi_reduction <add>, %18, %cst_15 [1] : vector<8x2048xf32> to vector<8xf32>
    %20 = vector.shape_cast %19 : vector<8xf32> to vector<8x1xf32>
    %21 = arith.addf %17, %20 : vector<8x1xf32>
    %c0_16 = arith.constant 0 : index
    %c0_17 = arith.constant 0 : index
    %22 = vector.load %arg7[%c0_16, %c0_17] : memref<8x1xf32, #tpu.memory_space<vmem>>, vector<8x1xf32>
    tpu.vector_store %arg7[%c0_16, %c0_17], %21 {strides = array<i32>} : memref<8x1xf32, #tpu.memory_space<vmem>>, vector<8x1xf32>,
    return
  }
  func.func @transform_0(%arg0: i32, %arg1: i32, %arg2: i32) -> (i32, i32) {
    %c1_i32 = arith.constant 1 : i32
    %0 = arith.muli %arg0, %c1_i32 : i32
    %1 = arith.addi %0, %arg2 : i32
    %c0_i32 = arith.constant 0 : i32
    return %arg1, %1 : i32, i32
  }
  func.func @transform_1(%arg0: i32, %arg1: i32, %arg2: i32) -> (i32, i32) {
    %c1_i32 = arith.constant 1 : i32
    %0 = arith.muli %arg0, %c1_i32 : i32
    %1 = arith.addi %0, %arg2 : i32
    %c0_i32 = arith.constant 0 : i32
    return %arg1, %1 : i32, i32
  }
  func.func @transform_2(%arg0: i32, %arg1: i32, %arg2: i32) -> (i32, i32) {
    %c1_i32 = arith.constant 1 : i32
    %0 = arith.muli %arg0, %c1_i32 : i32
    %1 = arith.addi %0, %arg1 : i32
    %c0_i32 = arith.constant 0 : i32
    %c0_i32_0 = arith.constant 0 : i32
    return %1, %c0_i32 : i32, i32
  }
  func.func @transform_3(%arg0: i32, %arg1: i32, %arg2: i32) -> (i32, i32) {
    %c1_i32 = arith.constant 1 : i32
    %0 = arith.muli %arg0, %c1_i32 : i32
    %1 = arith.addi %0, %arg1 : i32
    %c0_i32 = arith.constant 0 : i32
    %c0_i32_0 = arith.constant 0 : i32
    return %1, %c0_i32 : i32, i32
  }
  func.func @transform_4(%arg0: i32, %arg1: i32, %arg2: i32) -> (i32, i32) {
    %c1_i32 = arith.constant 1 : i32
    %0 = arith.muli %arg0, %c1_i32 : i32
    %1 = arith.addi %0, %arg1 : i32
    %c0_i32 = arith.constant 0 : i32
    %c0_i32_0 = arith.constant 0 : i32
    return %1, %c0_i32 : i32, i32
  }
}

</mosaic_0001>

<bundles_post_ra>
// kernel: jaccard_loss.1
= control target key start
LH: loop header
LB: loop body
LE: loop exit
PB: predicated region body
PF: predicated region fallthrough
CT: control target
= control target key end

     0   :  { %vm95_vm0 = vcmask 7168   ;;  %v322_v0 = vmov 0.0   ;;  %s480_s0 = inlined_call_operand.vmem [shape: f32[8,2048], index: 0, kind: input, shape index: {}]   ;;  %s481_s2 = inlined_call_operand.vmem [shape: f32[8,1], index: 2, kind: output, shape index: {0}]   ;;  %s482_s1 = inlined_call_operand.vmem [shape: f32[8,2048], index: 1, kind: input, shape index: {}]   ;;  %s483_s4 = inlined_call_operand.vmem [shape: f32[8,1], index: 4, kind: output, shape index: {2}]   ;;  %s484_s3 = inlined_call_operand.vmem [shape: f32[8,1], index: 3, kind: output, shape index: {1}]  }
   0x1   :  { %96 = vst.msk [vmem:[%s481_s2] sm:$0xff] %vm95_vm0, %v322_v0  ;;  %v99_v1 = vld [vmem:[%s480_s0] sm:$0xff]  ;;  %v100_v2 = vld [vmem:[%s480_s0 + $0x8] sm:$0xff]  ;;  %v101_v5 = vld [vmem:[%s480_s0 + $0x10] sm:$0xff] }
   0x2   :  { %v169_v3 = vmul.f32 %v99_v1, %v99_v1  ;;  %v170_v4 = vmul.f32 %v100_v2, %v100_v2  ;;  %v102_v6 = vld [vmem:[%s480_s0 + $0x18] sm:$0xff]  ;;  %v115_v7 = vld [vmem:[%s482_s1] sm:$0xff]  ;;  %v116_v8 = vld [vmem:[%s482_s1 + $0x8] sm:$0xff]  ;;  %v171_v16 = vmul.f32 %v101_v5, %v101_v5  ;;  %98 = vst.msk [vmem:[%s483_s4] sm:$0xff] %vm95_vm0, %v322_v0 }
   0x3   :  { %v117_v9 = vld [vmem:[%s482_s1 + $0x10] sm:$0xff]  ;;  %v118_v10 = vld [vmem:[%s482_s1 + $0x18] sm:$0xff]  ;;  %v132_v11 = vmul.f32 %v115_v7, %v99_v1  ;;  %v133_v12 = vmul.f32 %v116_v8, %v100_v2  ;;  %v103_v13 = vld [vmem:[%s480_s0 + $0x20] sm:$0xff]  ;;  %v205_v26 = vmul.f32 %v115_v7, %v115_v7  ;;  %v206_v27 = vmul.f32 %v116_v8, %v116_v8  ;;  %97 = vst.msk [vmem:[%s484_s3] sm:$0xff] %vm95_vm0, %v322_v0 }
   0x4   :  { %v119_v14 = vld [vmem:[%s482_s1 + $0x20] sm:$0xff]  ;;  %v134_v15 = vmul.f32 %v117_v9, %v101_v5  ;;  %v185_v17 = vadd.f32 %v170_v4, %v169_v3  ;;  %v135_v18 = vmul.f32 %v118_v10, %v102_v6  ;;  %v104_v20 = vld [vmem:[%s480_s0 + $0x28] sm:$0xff]  ;;  %v105_v24 = vld [vmem:[%s480_s0 + $0x30] sm:$0xff]  ;;  %v172_v28 = vmul.f32 %v102_v6, %v102_v6 }
   0x5   :  { %v148_v19 = vadd.f32 %v133_v12, %v132_v11  ;;  %v120_v21 = vld [vmem:[%s482_s1 + $0x28] sm:$0xff]  ;;  %v136_v22 = vmul.f32 %v119_v14, %v103_v13  ;;  %v121_v25 = vld [vmem:[%s482_s1 + $0x30] sm:$0xff]  ;;  %v106_v32 = vld [vmem:[%s480_s0 + $0x38] sm:$0xff]  ;;  %v207_v34 = vmul.f32 %v117_v9, %v117_v9  ;;  %v173_v35 = vmul.f32 %v103_v13, %v103_v13 }
   0x6   :  { %v186_v29 = vadd.f32 %v185_v17, %v171_v16  ;;  %v137_v30 = vmul.f32 %v120_v21, %v104_v20  ;;  %v122_v33 = vld [vmem:[%s482_s1 + $0x38] sm:$0xff]  ;;  %v138_v36 = vmul.f32 %v121_v25, %v105_v24  ;;  %v107_v38 = vld [vmem:[%s480_s0 + $0x40] sm:$0xff]  ;;  %v208_v40 = vmul.f32 %v118_v10, %v118_v10  ;;  %v108_v46 = vld [vmem:[%s480_s0 + $0x48] sm:$0xff] }
   0x7   :  { %v149_v23 = vadd.f32 %v148_v19, %v134_v15  ;;  %v123_v39 = vld [vmem:[%s482_s1 + $0x40] sm:$0xff]  ;;  %v221_v41 = vadd.f32 %v206_v27, %v205_v26  ;;  %v174_v42 = vmul.f32 %v104_v20, %v104_v20  ;;  %v139_v44 = vmul.f32 %v122_v33, %v106_v32  ;;  %v124_v47 = vld [vmem:[%s482_s1 + $0x48] sm:$0xff]  ;;  %v109_v54 = vld [vmem:[%s480_s0 + $0x50] sm:$0xff] }
   0x8   :  { %v187_v43 = vadd.f32 %v186_v29, %v172_v28  ;;  %v209_v48 = vmul.f32 %v119_v14, %v119_v14  ;;  %v175_v50 = vmul.f32 %v105_v24, %v105_v24  ;;  %v140_v52 = vmul.f32 %v123_v39, %v107_v38  ;;  %v125_v55 = vld [vmem:[%s482_s1 + $0x50] sm:$0xff]  ;;  %v110_v62 = vld [vmem:[%s480_s0 + $0x58] sm:$0xff]  ;;  %v111_v7 = vld [vmem:[%s480_s0 + $0x60] sm:$0xff] }
   0x9   :  { %v150_v31 = vadd.f32 %v149_v23, %v135_v18  ;;  %v222_v49 = vadd.f32 %v221_v41, %v207_v34  ;;  %v210_v56 = vmul.f32 %v120_v21, %v120_v21  ;;  %v176_v58 = vmul.f32 %v106_v32, %v106_v32  ;;  %v126_v63 = vld [vmem:[%s482_s1 + $0x58] sm:$0xff]  ;;  %v127_v8 = vld [vmem:[%s482_s1 + $0x60] sm:$0xff]  ;;  %v112_v15 = vld [vmem:[%s480_s0 + $0x68] sm:$0xff] }
   0xa   :  { %v188_v51 = vadd.f32 %v187_v43, %v173_v35  ;;  %v141_v60 = vmul.f32 %v124_v47, %v108_v46  ;;  %v211_v1 = vmul.f32 %v121_v25, %v121_v25  ;;  %v177_v3 = vmul.f32 %v107_v38, %v107_v38  ;;  %v128_v16 = vld [vmem:[%s482_s1 + $0x68] sm:$0xff]  ;;  %v113_v23 = vld [vmem:[%s480_s0 + $0x70] sm:$0xff]  ;;  %v130_v32 = vld [vmem:[%s482_s1 + $0x78] sm:$0xff] }
   0xb   :  { %v151_v37 = vadd.f32 %v150_v31, %v136_v22  ;;  %v223_v57 = vadd.f32 %v222_v49, %v208_v40  ;;  %v142_v5 = vmul.f32 %v125_v55, %v109_v54  ;;  %v212_v9 = vmul.f32 %v122_v33, %v122_v33  ;;  %v129_v24 = vld [vmem:[%s482_s1 + $0x70] sm:$0xff]  ;;  %v114_v31 = vld [vmem:[%s480_s0 + $0x78] sm:$0xff]  ;;  %v204_v0 = vld [vmem:[%s483_s4] sm:$0xff] }
   0xc   :  { %v189_v59 = vadd.f32 %v188_v51, %v174_v42  ;;  %v178_v11 = vmul.f32 %v108_v46, %v108_v46  ;;  %v143_v13 = vmul.f32 %v126_v63, %v110_v62  ;;  %v213_v17 = vmul.f32 %v123_v39, %v123_v39 }
   0xd   :  { %v152_v45 = vadd.f32 %v151_v37, %v137_v30  ;;  %v224_v2 = vadd.f32 %v223_v57, %v209_v48  ;;  %v179_v19 = vmul.f32 %v109_v54, %v109_v54  ;;  %v144_v21 = vmul.f32 %v127_v8, %v111_v7 }
   0xe   :  { %v190_v4 = vadd.f32 %v189_v59, %v175_v50  ;;  %v214_v25 = vmul.f32 %v124_v47, %v124_v47  ;;  %v180_v27 = vmul.f32 %v110_v62, %v110_v62  ;;  %v145_v29 = vmul.f32 %v128_v16, %v112_v15 }
   0xf   :  { %v153_v53 = vadd.f32 %v152_v45, %v138_v36  ;;  %v225_v10 = vadd.f32 %v224_v2, %v210_v56  ;;  %v215_v33 = vmul.f32 %v125_v55, %v125_v55  ;;  %v181_v35 = vmul.f32 %v111_v7, %v111_v7 }
  0x10   :  { %v191_v12 = vadd.f32 %v190_v4, %v176_v58  ;;  %v146_v37 = vmul.f32 %v129_v24, %v113_v23  ;;  %v216_v39 = vmul.f32 %v126_v63, %v126_v63  ;;  %v182_v41 = vmul.f32 %v112_v15, %v112_v15  ;;  %v131_v63 = vld [vmem:[%s481_s2] sm:$0xff] }
  0x11   :  { %v154_v61 = vadd.f32 %v153_v53, %v139_v44  ;;  %v226_v18 = vadd.f32 %v225_v10, %v211_v1  ;;  %v147_v43 = vmul.f32 %v130_v32, %v114_v31  ;;  %v217_v45 = vmul.f32 %v127_v8, %v127_v8 }
  0x12   :  { %v192_v20 = vadd.f32 %v191_v12, %v177_v3  ;;  %v183_v47 = vmul.f32 %v113_v23, %v113_v23  ;;  %v218_v50 = vmul.f32 %v128_v16, %v128_v16  ;;  %v219_v55 = vmul.f32 %v129_v24, %v129_v24  ;;  %v168_v3 = vld [vmem:[%s484_s3] sm:$0xff] }
  0x13   :  { %v155_v6 = vadd.f32 %v154_v61, %v140_v52  ;;  %v227_v26 = vadd.f32 %v226_v18, %v212_v9  ;;  %v184_v52 = vmul.f32 %v114_v31, %v114_v31  ;;  %v220_v58 = vmul.f32 %v130_v32, %v130_v32 }
  0x14   :  { %v193_v28 = vadd.f32 %v192_v20, %v178_v11 }
  0x15   :  { %v156_v14 = vadd.f32 %v155_v6, %v141_v60  ;;  %v228_v34 = vadd.f32 %v227_v26, %v213_v17 }
  0x16   :  { %v194_v36 = vadd.f32 %v193_v28, %v179_v19 }
  0x17   :  { %v157_v22 = vadd.f32 %v156_v14, %v142_v5  ;;  %v229_v40 = vadd.f32 %v228_v34, %v214_v25 }
  0x18   :  { %v195_v42 = vadd.f32 %v194_v36, %v180_v27 }
  0x19   :  { %v158_v30 = vadd.f32 %v157_v22, %v143_v13  ;;  %v230_v46 = vadd.f32 %v229_v40, %v215_v33 }
  0x1a   :  { %v196_v48 = vadd.f32 %v195_v42, %v181_v35 }
  0x1b   :  { %v159_v38 = vadd.f32 %v158_v30, %v144_v21  ;;  %v231_v51 = vadd.f32 %v230_v46, %v216_v39 }
  0x1c   :  { %v197_v53 = vadd.f32 %v196_v48, %v182_v41 }
  0x1d   :  { %v160_v44 = vadd.f32 %v159_v38, %v145_v29  ;;  %v232_v56 = vadd.f32 %v231_v51, %v217_v45 }
  0x1e   :  { %v198_v57 = vadd.f32 %v197_v53, %v183_v47 }
  0x1f   :  { %v161_v49 = vadd.f32 %v160_v44, %v146_v37  ;;  %v233_v59 = vadd.f32 %v232_v56, %v218_v50 }
  0x20   :  { %v199_v60 = vadd.f32 %v198_v57, %v184_v52 }
  0x21   :  { %v162_v54 = vadd.f32 %v161_v49, %v147_v43  ;;  %v234_v61 = vadd.f32 %v233_v59, %v219_v55 }
  0x23   :  { %163 = vadd.xlane.f32.xlu0 %v162_v54  ;;  %v235_v62 = vadd.f32 %v234_v61, %v220_v58 }
  0x25   :  { %236 = vadd.xlane.f32.xlu1 %v235_v62 }
  0x27   :  { %200 = vadd.xlane.f32.xlu0 %v199_v60 }
  0xb0   :  { %v164_v1 = vpop.xlane.xlu0 %163 }
  0xb1   :  { %v165_v2 = vadd.f32 %v164_v1, %v131_v63 }
  0xb2   :  { %v237_v6 = vpop.xlane.xlu1 %236 }
  0xb3   :  { %167 = vst.msk [vmem:[%s481_s2] sm:$0xff] %vm95_vm0, %v165_v2  ;;  %v238_v7 = vadd.f32 %v237_v6, %v204_v0 }
  0xb4   :  { %v201_v4 = vpop.xlane.xlu0 %200 }
  0xb5   :  { %v202_v5 = vadd.f32 %v201_v4, %v168_v3  ;;  %239 = vst.msk [vmem:[%s483_s4] sm:$0xff] %vm95_vm0, %v238_v7 }
  0xb7   :  { %203 = vst.msk [vmem:[%s484_s3] sm:$0xff] %vm95_vm0, %v202_v5 }

</bundles_post_ra>
